<compile_context>
chip_gen: v5e
topology: v5e:2x2
jax: 0.10.0
libtpu: 0.0.40
codegen_flags: <defaults>
</compile_context>

<pallas_src>
import functools

import jax
import jax.numpy as jnp
import numpy as np
from jax.experimental import pallas as pl
from jax.experimental.pallas import tpu as pltpu

_TAP = 128       # lanes per (tap, hi/lo) block of the fused table
_NC_ALIGN = 128  # lane-dense class padding


# ----------------------------- Pallas kernel -----------------------------

def _textcnn_kernel(tok_ref, table_ref, bias_ref, fcw_ref, fcb_ref, out_ref, *,
                    filter_sizes, num_filters, seq_len):
    """Fused gather+conv (one wide MXU matmul) + ReLU + max-pool + FC + softmax.

    tok_ref   : (TB, L)        int32  token ids for this batch tile (L on lanes)
    table_ref : (Vp, 2*S*128)  bf16   fused (embedding @ conv-tap) table, [hi | lo] halves
    bias_ref  : (1, 128)       f32    packed conv biases (block-major; pad lanes zero)
    fcw_ref   : (128, 128)     bf16   fc weight (rows block-major; pads zero)
    fcb_ref   : (1, 128)       f32    fc bias (padded classes = -1e30)
    out_ref   : (TB, 128)      f32    softmax probabilities (lane-dense, padded classes ~ 0)
    """
    L = seq_len
    NF = num_filters
    S = max(filter_sizes)
    TB = tok_ref.shape[0]
    R = TB * L
    Vp = table_ref.shape[0]
    HALF = table_ref.shape[1] // 2
    assert HALF == S * _TAP, "fused table width mismatch"

    f32, bf16 = jnp.float32, jnp.bfloat16

    # ---- (1) Token relayout: lane-major (TB, L) ids -> one id per sublane row (R, 1).
    #      Only iota compares + a tiny 0/1 selector matmul + a lane reduction are used
    #      (all exact for integer ids < 2^8), so no minor-dim reshape/transpose is needed.
    #        rows[r, :] = tok[r // L, :]     (row-replication selector matmul)
    #        tokcol[r]  = rows[r, r % L]     (tiled-identity mask + sum over lanes)
    r_idx = jax.lax.broadcasted_iota(jnp.int32, (R, TB), 0)
    b_idx = jax.lax.broadcasted_iota(jnp.int32, (R, TB), 1)
    rsel = jnp.where((r_idx >= b_idx * L) & (r_idx < b_idx * L + L), 1.0, 0.0)
    tok_b = tok_ref[...].astype(f32).astype(bf16)                 # ids < vocab: exact in bf16
    rows = jax.lax.dot_general(rsel.astype(bf16), tok_b,
                               dimension_numbers=(((1,), (0,)), ((), ())),
                               preferred_element_type=f32)        # (R, L)
    eye3 = (jax.lax.broadcasted_iota(jnp.int32, (TB, L, L), 1) ==
            jax.lax.broadcasted_iota(jnp.int32, (TB, L, L), 2))
    csel = jnp.where(eye3, 1.0, 0.0).reshape(R, L)                # leading-dim merge only
    tok_col = jnp.sum(rows * csel, axis=1, keepdims=True).astype(jnp.int32)   # (R, 1)

    # ---- (2) One-hot over the padded vocab (single select into the MXU operand dtype).
    vid = jax.lax.broadcasted_iota(jnp.int32, (R, Vp), 1)
    onehot = jnp.where(tok_col == vid, 1.0, 0.0).astype(bf16)     # (R, Vp)

    # ---- (3) ONE wide MXU matmul against the fused (embedding @ conv-tap) table.
    #      Lane layout: [tap0 | ... | tapS-1] for the hi half, same order for the lo half;
    #      each tap block is 128 lanes, so per-tap slices below are lane-aligned views and
    #      hi+lo reconstructs the f32 fold (taps s >= fs of a block are packed as zeros).
    y = jax.lax.dot_general(onehot, table_ref[...],
                            dimension_numbers=(((1,), (0,)), ((), ())),
                            preferred_element_type=f32)           # (R, 2*S*128) f32

    def tap(s):
        return (y[:, s * _TAP:(s + 1) * _TAP] +
                y[:, HALF + s * _TAP:HALF + (s + 1) * _TAP])

    # ---- (4) Tap alignment via sublane rolls (XLU) on narrow 128-lane slices, issued after
    #      the big matmul; wrapped / cross-sequence rows are masked out in step (5).
    acc = tap(0)
    for s in range(1, S):
        acc = acc + pltpu.roll(tap(s), shift=(R - s) % R, axis=0)
    acc = jnp.maximum(acc + bias_ref[...], 0.0)                   # bias + ReLU (f32)

    # ---- (5) Per-block valid-length mask built from iotas + scalars (no captured array
    #      constants), then global max pool.  Masking with 0 after ReLU is exact.
    ch = jax.lax.broadcasted_iota(jnp.int32, (L, _TAP), 1)
    pos = jax.lax.broadcasted_iota(jnp.int32, (L, _TAP), 0)
    lout = jnp.zeros((L, _TAP), jnp.int32)
    for blk, fs in enumerate(filter_sizes):
        in_blk = (ch >= blk * NF) & (ch < (blk + 1) * NF)
        lout = lout + jnp.where(in_blk, L - fs + 1, 0)
    valid = pos < lout                                            # pad channels: never valid
    acc3 = acc.reshape(TB, L, _TAP)                               # leading-dim split only
    pooled = jnp.max(jnp.where(valid[None], acc3, 0.0), axis=1)   # (TB, 128) f32, >= 0

    # ---- (6) FC on the MXU in bf16 (f32 accumulate) + numerically stable softmax; padded
    #      classes carry a -1e30 bias so their probability underflows to exactly 0.
    logits = jax.lax.dot_general(pooled.astype(bf16), fcw_ref[...],
                                 dimension_numbers=(((1,), (0,)), ((), ())),
                                 preferred_element_type=f32) + fcb_ref[...]
    m = jnp.max(logits, axis=-1, keepdims=True)
    e = jnp.exp(logits - m)
    inv = pl.reciprocal(jnp.sum(e, axis=-1, keepdims=True), approx=True)   # EUP slot
    out_ref[...] = (e * inv).astype(out_ref.dtype)


# ----------------------------- One-time parameter prep -----------------------------

def prepare_params(params, *, filter_sizes, num_filters, num_classes):
    """One-time re-layout of PyTorch-layout params into kernel layout.

    Builds the fused table T[v, s*128 + blk*NF + nf] = sum_e emb[v, e] * conv_blk_w[nf, e, s]
    (f32-accurate fold, stored as bf16 hi + bf16 lo concatenated along lanes)."""
    NF = num_filters
    n_blk = len(filter_sizes)
    NT = n_blk * NF
    S = max(filter_sizes)
    NC = num_classes
    NC_PAD = _NC_ALIGN * int(np.ceil(NC / _NC_ALIGN))
    assert NT <= _TAP, "num_filters * len(filter_sizes) must be <= 128"

    emb = np.asarray(params["embedding"], np.float64)             # (V, E)
    V, _ = emb.shape
    Vp = 128 * int(np.ceil(V / 128))

    tbl = np.zeros((Vp, S * _TAP), np.float64)
    for s in range(S):
        for blk, fs in enumerate(filter_sizes):
            if s < fs:
                w_s = np.asarray(params[f"conv{blk}_w"], np.float64)[:, :, s]   # (NF, E)
                col = s * _TAP + blk * NF
                tbl[:V, col:col + NF] = emb @ w_s.T               # (V, NF)
    tbl32 = jnp.asarray(tbl.astype(np.float32))
    hi = tbl32.astype(jnp.bfloat16)
    lo = (tbl32 - hi.astype(jnp.float32)).astype(jnp.bfloat16)
    table = jnp.concatenate([hi, lo], axis=1)                     # (Vp, 2*S*128) bf16

    b_pack = np.zeros((1, _TAP), np.float32)
    for blk in range(n_blk):
        b_pack[0, blk * NF:(blk + 1) * NF] = np.asarray(params[f"conv{blk}_b"], np.float32)

    # PyTorch flatten after cat(dim=2).view is filter-major (nf*n_blk + blk); kernel pooled
    # features are block-major (blk*NF + nf) -> permute fc rows, pad to lane-dense shapes.
    W = np.asarray(params["fc_w"], np.float32)                    # (NC, NF*n_blk)
    fc_rows = W.reshape(NC, NF, n_blk).transpose(2, 1, 0).reshape(NT, NC)
    fc_w = np.zeros((_TAP, NC_PAD), np.float32)
    fc_w[:NT, :NC] = fc_rows
    fc_b = np.full((1, NC_PAD), -1e30, np.float32)
    fc_b[0, :NC] = np.asarray(params["fc_b"], np.float32)

    return {
        "table": table,
        "b_pack": jnp.asarray(b_pack),
        "fc_w": jnp.asarray(fc_w, dtype=jnp.bfloat16),
        "fc_b": jnp.asarray(fc_b),
    }


# ----------------------------- Wrapper / glue -----------------------------

def textcnn_forward(tokens, prep, *, filter_sizes, num_filters, num_classes,
                    batch_tile=None,
                    vmem_limit_bytes=48 * 1024 * 1024,
                    vmem_workingset_budget=20 * 1024 * 1024):
    """tokens: int32 [B, L] token ids.  prep: output of prepare_params.
    Returns softmax probabilities [B, num_classes]."""
    tokens = jnp.asarray(tokens, jnp.int32)
    B, L = tokens.shape
    if L % 8 != 0:
        # TODO(synk): auto-pad L to a multiple of 8 (the per-block valid-length mask already
        #             supports it); for now require sublane-aligned sequence lengths.
        raise ValueError("max_sent_len must be a multiple of 8; pad sequences in the caller.")

    table, b_pack, fc_w, fc_b = prep["table"], prep["b_pack"], prep["fc_w"], prep["fc_b"]
    Vp, wide = table.shape
    NC_PAD = fc_w.shape[1]

    # Batch tile from a VMEM working-set budget (live f32 slabs scale with TB*L rows); keep
    # >= 2 grid programs once B >= 16 so ("parallel",) can shard over v7x's 2 TensorCores.
    bytes_per_row = wide * 4 + 2 * _TAP * 4 + Vp * 2 + 512
    tb = max(1, int(vmem_workingset_budget // bytes_per_row) // L)
    tb = min(tb, 128)
    if batch_tile is not None:
        tb = int(batch_tile)
    if B >= 16:
        tb = min(tb, max(8, 8 * int(pl.cdiv(pl.cdiv(B, 2), 8))))
    TB = B if tb >= B else max(8, (tb // 8) * 8)

    n_tiles = int(pl.cdiv(B, TB))
    B_pad = n_tiles * TB
    if B_pad != B:
        # Explicit zero padding of the batch (padded rows select embedding row 0 and are
        # sliced off below) instead of relying on out-of-bounds block reads.
        tokens = jnp.pad(tokens, ((0, B_pad - B), (0, 0)))

    kernel = functools.partial(_textcnn_kernel,
                               filter_sizes=tuple(int(f) for f in filter_sizes),
                               num_filters=int(num_filters), seq_len=int(L))

    flops = int(2 * B_pad * L * Vp * wide            # fused gather+conv matmul
                + 2 * B_pad * L * TB * L             # token flatten selector matmul
                + 2 * B_pad * _TAP * NC_PAD)         # fc
    bytes_accessed = int(tokens.size * 4 + B_pad * NC_PAD * 4
                         + n_tiles * (table.size * 2 + b_pack.size * 4
                                      + fc_w.size * 2 + fc_b.size * 4))

    out_padded = pl.pallas_call(
        kernel,
        out_shape=jax.ShapeDtypeStruct((B_pad, NC_PAD), jnp.float32),
        grid=(n_tiles,),
        in_specs=[
            pl.BlockSpec((TB, L), lambda i: (i, 0)),          # token ids (lane dim = L)
            pl.BlockSpec((Vp, wide), lambda i: (0, 0)),       # fused gather+conv table
            pl.BlockSpec(b_pack.shape, lambda i: (0, 0)),     # conv bias
            pl.BlockSpec(fc_w.shape, lambda i: (0, 0)),       # fc weight
            pl.BlockSpec(fc_b.shape, lambda i: (0, 0)),       # fc bias
        ],
        out_specs=pl.BlockSpec((TB, NC_PAD), lambda i: (i, 0)),
        compiler_params=pltpu.CompilerParams(
            dimension_semantics=("parallel",),
            vmem_limit_bytes=int(vmem_limit_bytes)),
        cost_estimate=pl.CostEstimate(flops=flops,
                                      transcendentals=int(B_pad * NC_PAD),
                                      bytes_accessed=bytes_accessed),
    )(tokens, table, b_pack, fc_w, fc_b)

    return out_padded[:B, :num_classes]


# ----------------------------- Pure-JAX reference -----------------------------

def textcnn_reference(tokens, params, *, filter_sizes, num_filters, num_classes):
    """Faithful float32 port of the PyTorch module (eval mode: dropout is identity)."""
    del num_filters, num_classes
    hp = jax.lax.Precision.HIGHEST
    emb = jnp.take(jnp.asarray(params["embedding"], jnp.float32), tokens, axis=0)  # (B, L, E)
    x = jnp.transpose(emb, (0, 2, 1))                                              # (B, E, L)
    feats = []
    for i, fs in enumerate(filter_sizes):
        w = jnp.asarray(params[f"conv{i}_w"], jnp.float32)                          # (NF, E, fs)
        b = jnp.asarray(params[f"conv{i}_b"], jnp.float32)
        y = jax.lax.conv_general_dilated(x, w, window_strides=(1,), padding="VALID",
                                         dimension_numbers=("NCH", "OIH", "NCH"),
                                         precision=hp)                              # (B, NF, Lo)
        y = jnp.maximum(y + b[None, :, None], 0.0)
        feats.append(jnp.max(y, axis=2, keepdims=True))                             # (B, NF, 1)
    out = jnp.concatenate(feats, axis=2).reshape(tokens.shape[0], -1)               # (B, NF*nb)
    logits = jnp.dot(out, jnp.asarray(params["fc_w"], jnp.float32).T, precision=hp) \
        + jnp.asarray(params["fc_b"], jnp.float32)
    return jax.nn.softmax(logits, axis=1)


# ----------------------------- Main -----------------------------

if __name__ == "__main__":
    # Small shapes consistent with the module.
    B = 2
    max_sent_len = 16
    embedding_dim = 32
    filter_sizes = (3, 4, 5)
    num_filters = 8
    vocab_size = 50
    num_classes = 3

    key = jax.random.PRNGKey(0)
    keys = jax.random.split(key, 10)

    params = {
        "embedding": jax.random.normal(keys[0], (vocab_size, embedding_dim), jnp.float32) * 0.1,
        "fc_w": jax.random.normal(keys[1], (num_classes, num_filters * len(filter_sizes)),
                                  jnp.float32) * 0.1,
        "fc_b": jax.random.normal(keys[2], (num_classes,), jnp.float32) * 0.1,
    }
    for i, fs in enumerate(filter_sizes):
        params[f"conv{i}_w"] = jax.random.normal(
            keys[3 + 2 * i], (num_filters, embedding_dim, fs), jnp.float32) * 0.1
        params[f"conv{i}_b"] = jax.random.normal(
            keys[4 + 2 * i], (num_filters,), jnp.float32) * 0.1

    tokens = jax.random.randint(keys[9], (B, max_sent_len), 0, vocab_size, dtype=jnp.int32)

    prep = prepare_params(params, filter_sizes=filter_sizes,
                          num_filters=num_filters, num_classes=num_classes)

    out = textcnn_forward(tokens, prep,
                          filter_sizes=filter_sizes,
                          num_filters=num_filters,
                          num_classes=num_classes)
    out = jax.block_until_ready(out)

    ref = jax.block_until_ready(
        textcnn_reference(tokens, params, filter_sizes=filter_sizes,
                          num_filters=num_filters, num_classes=num_classes))

    # Tolerance budget: the conv path is ~f32-exact (hi/lo fused table); the remaining
    # deviation comes from the bf16 FC matmul and the approximate (EUP) softmax reciprocal.
    np.testing.assert_allclose(np.asarray(out), np.asarray(ref), rtol=2e-2, atol=2e-3)
    assert out.shape == (B, num_classes)
    np.testing.assert_allclose(np.asarray(out).sum(axis=1), np.ones(B), rtol=0, atol=2e-2)

    print("KERNEL_OK")
</pallas_src>

<mosaic_0001>
module attributes {stable_mosaic.version = 11 : i64} {
  func.func @_textcnn_kernel(%arg0: i32, %arg1: memref<2x16xi32, #tpu.memory_space<vmem>>, %arg2: memref<128x1280xbf16, #tpu.memory_space<vmem>>, %arg3: memref<1x128xf32, #tpu.memory_space<vmem>>, %arg4: memref<128x128xbf16, #tpu.memory_space<vmem>>, %arg5: memref<1x128xf32, #tpu.memory_space<vmem>>, %arg6: memref<2x128xf32, #tpu.memory_space<vmem>>) attributes {dimension_semantics = [#tpu.dimension_semantics<parallel>], iteration_bounds = array<i64: 1>, scalar_prefetch = 0 : i64, scratch_operands = 0 : i64, tpu.core_type = #tpu.core_type<tc>, window_params = [{transform_indices = @transform_0, window_bounds = array<i64: 2, 16>}, {pipeline_mode = #tpu.pipeline_mode<synchronous>, transform_indices = @transform_1, window_bounds = array<i64: 128, 1280>}, {pipeline_mode = #tpu.pipeline_mode<synchronous>, transform_indices = @transform_2, window_bounds = array<i64: 1, 128>}, {pipeline_mode = #tpu.pipeline_mode<synchronous>, transform_indices = @transform_3, window_bounds = array<i64: 128, 128>}, {pipeline_mode = #tpu.pipeline_mode<synchronous>, transform_indices = @transform_4, window_bounds = array<i64: 1, 128>}, {transform_indices = @transform_5, window_bounds = array<i64: 2, 128>}]} {
    %0 = tpu.iota {dimensions = array<i32: 0>} : vector<32x2xi32>
    %1 = tpu.iota {dimensions = array<i32: 1>} : vector<32x2xi32>
    %c16_i32 = arith.constant 16 : i32
    %2 = vector.broadcast %c16_i32 : i32 to vector<32x2xi32>
    %3 = arith.muli %1, %2 : vector<32x2xi32>
    %4 = arith.cmpi sge, %0, %3 : vector<32x2xi32>
    %c16_i32_0 = arith.constant 16 : i32
    %5 = vector.broadcast %c16_i32_0 : i32 to vector<32x2xi32>
    %6 = arith.muli %1, %5 : vector<32x2xi32>
    %c16_i32_1 = arith.constant 16 : i32
    %7 = vector.broadcast %c16_i32_1 : i32 to vector<32x2xi32>
    %8 = arith.addi %6, %7 : vector<32x2xi32>
    %9 = arith.cmpi slt, %0, %8 : vector<32x2xi32>
    %10 = arith.andi %4, %9 : vector<32x2xi1>
    %cst = arith.constant 1.000000e+00 : f32
    %cst_2 = arith.constant 0.000000e+00 : f32
    %11 = vector.broadcast %cst : f32 to vector<32x2xf32>
    %12 = vector.broadcast %cst_2 : f32 to vector<32x2xf32>
    %13 = arith.select %10, %11, %12 : vector<32x2xi1>, vector<32x2xf32>
    %c0 = arith.constant 0 : index
    %c0_3 = arith.constant 0 : index
    %14 = vector.load %arg1[%c0, %c0_3] : memref<2x16xi32, #tpu.memory_space<vmem>>, vector<2x16xi32>
    %15 = arith.sitofp %14 : vector<2x16xi32> to vector<2x16xf32>
    %16 = arith.truncf %15 : vector<2x16xf32> to vector<2x16xbf16>
    %17 = arith.truncf %13 : vector<32x2xf32> to vector<32x2xbf16>
    %cst_4 = arith.constant dense<0.000000e+00> : vector<32x16xf32>
    %18 = tpu.matmul %17, %16, %cst_4 {dimension_numbers = #tpu.dot_dimension_numbers<[1], [0], [0], [1], [0, 0, 1, 1], [], []>} : vector<32x2xbf16>, vector<2x16xbf16>, vector<32x16xf32> -> vector<32x16xf32>
    %19 = tpu.iota {dimensions = array<i32: 1>} : vector<2x16x16xi32>
    %20 = tpu.iota {dimensions = array<i32: 2>} : vector<2x16x16xi32>
    %21 = arith.cmpi eq, %19, %20 : vector<2x16x16xi32>
    %cst_5 = arith.constant 1.000000e+00 : f32
    %cst_6 = arith.constant 0.000000e+00 : f32
    %22 = vector.broadcast %cst_5 : f32 to vector<2x16x16xf32>
    %23 = vector.broadcast %cst_6 : f32 to vector<2x16x16xf32>
    %24 = arith.select %21, %22, %23 : vector<2x16x16xi1>, vector<2x16x16xf32>
    %25 = vector.shape_cast %24 : vector<2x16x16xf32> to vector<32x16xf32>
    %26 = arith.mulf %18, %25 : vector<32x16xf32>
    %cst_7 = arith.constant dense<0.000000e+00> : vector<32xf32>
    %27 = vector.multi_reduction <add>, %26, %cst_7 [1] : vector<32x16xf32> to vector<32xf32>
    %28 = vector.shape_cast %27 : vector<32xf32> to vector<32x1xf32>
    %29 = arith.fptosi %28 : vector<32x1xf32> to vector<32x1xi32>
    %30 = tpu.iota {dimensions = array<i32: 1>} : vector<32x128xi32>
    %31 = vector.broadcast %29 : vector<32x1xi32> to vector<32x128xi32>
    %32 = arith.cmpi eq, %31, %30 : vector<32x128xi32>
    %cst_8 = arith.constant 1.000000e+00 : f32
    %cst_9 = arith.constant 0.000000e+00 : f32
    %33 = vector.broadcast %cst_8 : f32 to vector<32x128xf32>
    %34 = vector.broadcast %cst_9 : f32 to vector<32x128xf32>
    %35 = arith.select %32, %33, %34 : vector<32x128xi1>, vector<32x128xf32>
    %36 = arith.truncf %35 : vector<32x128xf32> to vector<32x128xbf16>
    %c0_10 = arith.constant 0 : index
    %c0_11 = arith.constant 0 : index
    %37 = vector.load %arg2[%c0_10, %c0_11] : memref<128x1280xbf16, #tpu.memory_space<vmem>>, vector<128x1280xbf16>
    %cst_12 = arith.constant dense<0.000000e+00> : vector<32x1280xf32>
    %38 = tpu.matmul %36, %37, %cst_12 {dimension_numbers = #tpu.dot_dimension_numbers<[1], [0], [0], [1], [0, 0, 1, 1], [], []>} : vector<32x128xbf16>, vector<128x1280xbf16>, vector<32x1280xf32> -> vector<32x1280xf32>
    %39 = vector.extract_strided_slice %38 {offsets = [0, 0], sizes = [32, 128], strides = [1, 1]} : vector<32x1280xf32> to vector<32x128xf32>
    %40 = vector.extract_strided_slice %38 {offsets = [0, 640], sizes = [32, 128], strides = [1, 1]} : vector<32x1280xf32> to vector<32x128xf32>
    %41 = arith.addf %39, %40 : vector<32x128xf32>
    %42 = vector.extract_strided_slice %38 {offsets = [0, 128], sizes = [32, 128], strides = [1, 1]} : vector<32x1280xf32> to vector<32x128xf32>
    %43 = vector.extract_strided_slice %38 {offsets = [0, 768], sizes = [32, 128], strides = [1, 1]} : vector<32x1280xf32> to vector<32x128xf32>
    %44 = arith.addf %42, %43 : vector<32x128xf32>
    %c31_i32 = arith.constant 31 : i32
    %45 = tpu.dynamic_rotate %44 by %c31_i32 dim 0 : vector<32x128xf32>, i32 -> vector<32x128xf32>
    %46 = arith.addf %41, %45 : vector<32x128xf32>
    %47 = vector.extract_strided_slice %38 {offsets = [0, 256], sizes = [32, 128], strides = [1, 1]} : vector<32x1280xf32> to vector<32x128xf32>
    %48 = vector.extract_strided_slice %38 {offsets = [0, 896], sizes = [32, 128], strides = [1, 1]} : vector<32x1280xf32> to vector<32x128xf32>
    %49 = arith.addf %47, %48 : vector<32x128xf32>
    %c30_i32 = arith.constant 30 : i32
    %50 = tpu.dynamic_rotate %49 by %c30_i32 dim 0 : vector<32x128xf32>, i32 -> vector<32x128xf32>
    %51 = arith.addf %46, %50 : vector<32x128xf32>
    %52 = vector.extract_strided_slice %38 {offsets = [0, 384], sizes = [32, 128], strides = [1, 1]} : vector<32x1280xf32> to vector<32x128xf32>
    %53 = vector.extract_strided_slice %38 {offsets = [0, 1024], sizes = [32, 128], strides = [1, 1]} : vector<32x1280xf32> to vector<32x128xf32>
    %54 = arith.addf %52, %53 : vector<32x128xf32>
    %c29_i32 = arith.constant 29 : i32
    %55 = tpu.dynamic_rotate %54 by %c29_i32 dim 0 : vector<32x128xf32>, i32 -> vector<32x128xf32>
    %56 = arith.addf %51, %55 : vector<32x128xf32>
    %57 = vector.extract_strided_slice %38 {offsets = [0, 512], sizes = [32, 128], strides = [1, 1]} : vector<32x1280xf32> to vector<32x128xf32>
    %58 = vector.extract_strided_slice %38 {offsets = [0, 1152], sizes = [32, 128], strides = [1, 1]} : vector<32x1280xf32> to vector<32x128xf32>
    %59 = arith.addf %57, %58 : vector<32x128xf32>
    %c28_i32 = arith.constant 28 : i32
    %60 = tpu.dynamic_rotate %59 by %c28_i32 dim 0 : vector<32x128xf32>, i32 -> vector<32x128xf32>
    %61 = arith.addf %56, %60 : vector<32x128xf32>
    %c0_13 = arith.constant 0 : index
    %c0_14 = arith.constant 0 : index
    %62 = vector.load %arg3[%c0_13, %c0_14] : memref<1x128xf32, #tpu.memory_space<vmem>>, vector<1x128xf32>
    %63 = vector.broadcast %62 : vector<1x128xf32> to vector<32x128xf32>
    %64 = arith.addf %61, %63 : vector<32x128xf32>
    %cst_15 = arith.constant 0.000000e+00 : f32
    %65 = vector.broadcast %cst_15 : f32 to vector<32x128xf32>
    %66 = arith.maximumf %64, %65 : vector<32x128xf32>
    %67 = tpu.iota {dimensions = array<i32: 1>} : vector<16x128xi32>
    %68 = tpu.iota {dimensions = array<i32: 0>} : vector<16x128xi32>
    %c0_i32 = arith.constant 0 : i32
    %69 = vector.broadcast %c0_i32 : i32 to vector<16x128xi32>
    %c0_i32_16 = arith.constant 0 : i32
    %70 = vector.broadcast %c0_i32_16 : i32 to vector<16x128xi32>
    %71 = arith.cmpi sge, %67, %70 : vector<16x128xi32>
    %c8_i32 = arith.constant 8 : i32
    %72 = vector.broadcast %c8_i32 : i32 to vector<16x128xi32>
    %73 = arith.cmpi slt, %67, %72 : vector<16x128xi32>
    %74 = arith.andi %71, %73 : vector<16x128xi1>
    %c14_i32 = arith.constant 14 : i32
    %c0_i32_17 = arith.constant 0 : i32
    %75 = vector.broadcast %c14_i32 : i32 to vector<16x128xi32>
    %76 = vector.broadcast %c0_i32_17 : i32 to vector<16x128xi32>
    %77 = arith.select %74, %75, %76 : vector<16x128xi1>, vector<16x128xi32>
    %78 = arith.addi %69, %77 : vector<16x128xi32>
    %c8_i32_18 = arith.constant 8 : i32
    %79 = vector.broadcast %c8_i32_18 : i32 to vector<16x128xi32>
    %80 = arith.cmpi sge, %67, %79 : vector<16x128xi32>
    %c16_i32_19 = arith.constant 16 : i32
    %81 = vector.broadcast %c16_i32_19 : i32 to vector<16x128xi32>
    %82 = arith.cmpi slt, %67, %81 : vector<16x128xi32>
    %83 = arith.andi %80, %82 : vector<16x128xi1>
    %c13_i32 = arith.constant 13 : i32
    %c0_i32_20 = arith.constant 0 : i32
    %84 = vector.broadcast %c13_i32 : i32 to vector<16x128xi32>
    %85 = vector.broadcast %c0_i32_20 : i32 to vector<16x128xi32>
    %86 = arith.select %83, %84, %85 : vector<16x128xi1>, vector<16x128xi32>
    %87 = arith.addi %78, %86 : vector<16x128xi32>
    %c16_i32_21 = arith.constant 16 : i32
    %88 = vector.broadcast %c16_i32_21 : i32 to vector<16x128xi32>
    %89 = arith.cmpi sge, %67, %88 : vector<16x128xi32>
    %c24_i32 = arith.constant 24 : i32
    %90 = vector.broadcast %c24_i32 : i32 to vector<16x128xi32>
    %91 = arith.cmpi slt, %67, %90 : vector<16x128xi32>
    %92 = arith.andi %89, %91 : vector<16x128xi1>
    %c12_i32 = arith.constant 12 : i32
    %c0_i32_22 = arith.constant 0 : i32
    %93 = vector.broadcast %c12_i32 : i32 to vector<16x128xi32>
    %94 = vector.broadcast %c0_i32_22 : i32 to vector<16x128xi32>
    %95 = arith.select %92, %93, %94 : vector<16x128xi1>, vector<16x128xi32>
    %96 = arith.addi %87, %95 : vector<16x128xi32>
    %97 = arith.cmpi slt, %68, %96 : vector<16x128xi32>
    %98 = vector.shape_cast %66 : vector<32x128xf32> to vector<2x16x128xf32>
    %99 = vector.shape_cast %97 : vector<16x128xi1> to vector<1x16x128xi1>
    %cst_23 = arith.constant 0.000000e+00 : f32
    %100 = vector.shape_cast %99 : vector<1x16x128xi1> to vector<1x16x128xi1>
    %101 = vector.broadcast %100 : vector<1x16x128xi1> to vector<2x16x128xi1>
    %102 = vector.broadcast %cst_23 : f32 to vector<2x16x128xf32>
    %103 = arith.select %101, %98, %102 : vector<2x16x128xi1>, vector<2x16x128xf32>
    %cst_24 = arith.constant dense<0xFF800000> : vector<2x128xf32>
    %104 = vector.multi_reduction <maximumf>, %103, %cst_24 [1] : vector<2x16x128xf32> to vector<2x128xf32>
    %105 = arith.truncf %104 : vector<2x128xf32> to vector<2x128xbf16>
    %c0_25 = arith.constant 0 : index
    %c0_26 = arith.constant 0 : index
    %106 = vector.load %arg4[%c0_25, %c0_26] : memref<128x128xbf16, #tpu.memory_space<vmem>>, vector<128x128xbf16>
    %cst_27 = arith.constant dense<0.000000e+00> : vector<2x128xf32>
    %107 = tpu.matmul %105, %106, %cst_27 {dimension_numbers = #tpu.dot_dimension_numbers<[1], [0], [0], [1], [0, 0, 1, 1], [], []>} : vector<2x128xbf16>, vector<128x128xbf16>, vector<2x128xf32> -> vector<2x128xf32>
    %c0_28 = arith.constant 0 : index
    %c0_29 = arith.constant 0 : index
    %108 = vector.load %arg5[%c0_28, %c0_29] : memref<1x128xf32, #tpu.memory_space<vmem>>, vector<1x128xf32>
    %109 = vector.broadcast %108 : vector<1x128xf32> to vector<2x128xf32>
    %110 = arith.addf %107, %109 : vector<2x128xf32>
    %cst_30 = arith.constant dense<0xFF800000> : vector<2xf32>
    %111 = vector.multi_reduction <maximumf>, %110, %cst_30 [1] : vector<2x128xf32> to vector<2xf32>
    %112 = vector.shape_cast %111 : vector<2xf32> to vector<2x1xf32>
    %113 = vector.broadcast %112 : vector<2x1xf32> to vector<2x128xf32>
    %114 = arith.subf %110, %113 : vector<2x128xf32>
    %115 = math.exp %114 : vector<2x128xf32>
    %cst_31 = arith.constant dense<0.000000e+00> : vector<2xf32>
    %116 = vector.multi_reduction <add>, %115, %cst_31 [1] : vector<2x128xf32> to vector<2xf32>
    %117 = vector.shape_cast %116 : vector<2xf32> to vector<2x1xf32>
    %118 = tpu.reciprocal %117 {approx = true} : vector<2x1xf32> -> vector<2x1xf32>
    %119 = vector.broadcast %118 : vector<2x1xf32> to vector<2x128xf32>
    %120 = arith.mulf %115, %119 : vector<2x128xf32>
    %c0_32 = arith.constant 0 : index
    %c0_33 = arith.constant 0 : index
    %121 = vector.load %arg6[%c0_32, %c0_33] : memref<2x128xf32, #tpu.memory_space<vmem>>, vector<2x128xf32>
    tpu.vector_store %arg6[%c0_32, %c0_33], %120 {strides = array<i32>} : memref<2x128xf32, #tpu.memory_space<vmem>>, vector<2x128xf32>,
    return
  }
  func.func @transform_0(%arg0: i32) -> (i32, i32) {
    %c0_i32 = arith.constant 0 : i32
    %c0_i32_0 = arith.constant 0 : i32
    return %arg0, %c0_i32 : i32, i32
  }
  func.func @transform_1(%arg0: i32) -> (i32, i32) {
    %c0_i32 = arith.constant 0 : i32
    %c0_i32_0 = arith.constant 0 : i32
    %c0_i32_1 = arith.constant 0 : i32
    return %c0_i32, %c0_i32_0 : i32, i32
  }
  func.func @transform_2(%arg0: i32) -> (i32, i32) {
    %c0_i32 = arith.constant 0 : i32
    %c0_i32_0 = arith.constant 0 : i32
    %c0_i32_1 = arith.constant 0 : i32
    return %c0_i32, %c0_i32_0 : i32, i32
  }
  func.func @transform_3(%arg0: i32) -> (i32, i32) {
    %c0_i32 = arith.constant 0 : i32
    %c0_i32_0 = arith.constant 0 : i32
    %c0_i32_1 = arith.constant 0 : i32
    return %c0_i32, %c0_i32_0 : i32, i32
  }
  func.func @transform_4(%arg0: i32) -> (i32, i32) {
    %c0_i32 = arith.constant 0 : i32
    %c0_i32_0 = arith.constant 0 : i32
    %c0_i32_1 = arith.constant 0 : i32
    return %c0_i32, %c0_i32_0 : i32, i32
  }
  func.func @transform_5(%arg0: i32) -> (i32, i32) {
    %c0_i32 = arith.constant 0 : i32
    %c0_i32_0 = arith.constant 0 : i32
    return %arg0, %c0_i32 : i32, i32
  }
}

</mosaic_0001>

<bundles_post_ra>
// kernel: tpu_custom_call.1
= control target key start
LH: loop header
LB: loop body
LE: loop exit
PB: predicated region body
PF: predicated region fallthrough
CT: control target
= control target key end

     0   :  { %10 = vsyncpa [#allocation3], 0  ;;  %s1980_s0 = inlined_call_operand.hbm [shape: s32[2,16], index: 0, kind: input, shape index: {}]   ;;  %s1981_s1 = inlined_call_operand.hbm [shape: bf16[128,1280], index: 1, kind: input, shape index: {}]   ;;  %s1982_s2 = inlined_call_operand.vmem [shape: f32[1,128], index: 2, kind: input, shape index: {}]   ;;  %s1983_s3 = inlined_call_operand.hbm [shape: bf16[128,128], index: 3, kind: input, shape index: {}]   ;;  %s1984_s4 = inlined_call_operand.vmem [shape: f32[1,128], index: 4, kind: input, shape index: {}]   ;;  %s1985_s5 = inlined_call_operand.hbm [shape: f32[2,128], index: 5, kind: output, shape index: {}]  }
   0x1   :  { %11 = vsyncpa [#allocation6], 0  ;;  %s28_s20 = sshll.u32 %s1981_s1, 4  ;;  %s29_s20 = int_to_ptr.hbm [resolvable:$true] %s28_s20 }
   0x2   :  { %12 = vsyncpa [#allocation4], 0  ;;  %s1705_s21 = smov [#allocation5]   ;;  %s18_s25 = sshll.u32 %s1980_s0, 4  ;;  %s19_s25 = int_to_ptr.hbm [resolvable:$true] %s18_s25 }
   0x3   :  { %s30_s22 = sshll.u32 %s1705_s21, 4  ;;  %s1706_s26 = smov 640   ;;  %s31_s22 = int_to_ptr.vmem [resolvable:$true] %s30_s22 }
   0x4   :  { %s1707_s27 = smov 40   ;;  %s1708_s28 = smov [#allocation2]  }
   0x5   :  { %36 = dma.hbm_to_vmem [thread:$0]  %s29_s20, 10240, %s31_s22, [#allocation6], %s1706_s26, %s1706_s26, %s1707_s27  }
   0x6   :  { %s20_s29 = sshll.u32 %s1708_s28, 4  ;;  %s43_s7 = sshll.u32 %s1983_s3, 4  ;;  %s21_s29 = int_to_ptr.vmem [resolvable:$true] %s20_s29  ;;  %s44_s7 = int_to_ptr.hbm [resolvable:$true] %s43_s7 }
   0x7   :  { %23 = dma.hbm_to_vmem [thread:$0]  %s19_s25, 32, %s21_s29, [#allocation3]  }
   0x8   :  { %s1709_s1 = smov [#allocation7]   ;;  %s1710_s9 = smov 64  }
   0x9   :  { %s45_s8 = sshll.u32 %s1709_s1, 4  ;;  %s1711_s10 = smov 4   ;;  %s46_s8 = int_to_ptr.vmem [resolvable:$true] %s45_s8 }
   0xa   :  { %51 = dma.hbm_to_vmem [thread:$0]  %s44_s7, 1024, %s46_s8, [#allocation6], %s1710_s9, %s1710_s9, %s1711_s10  }
   0xb   :  { %1699 = dma.done.wait [#allocation3], 32  }
   0xc   :  { %1700 = vsyncadd [#allocation3], 4294967264 }
   0xd   :  { %1701 = dma.done.wait [#allocation6], 11264  }
   0xe   :  { %1702 = vsyncadd [#allocation6], 4294956032  ;;  %v67_v0 = vlaneseq  ;;  %v92_v6 = vld [vmem:[#allocation2] sm:$0x3]  ;;  %vm104_vm4 = vcmask 1040384   ;;  %v1712_v9 = vmov 0.0  }
   0xf   :  { %v93_v7 = vcvt.s32.f32 %v92_v6  ;;  %vm97_vm7 = vcmask 15360   ;;  %vm135_vm15 = vcmask 130048   ;;  %v1360_v20 = vld [vmem:[#allocation5 + $0x230] sm:$0xf]  ;;  %v1545_v21 = vld [vmem:[#allocation5 + $0x254] sm:$0xf0] }
  0x10   :  { %v1755_v1 = vshrl.u32 %v67_v0, 7  ;;  %v1757_v2 = vand.u32 127, %v67_v0  ;;  %v1540_v22 = vld [vmem:[#allocation5 + $0x234] sm:$0xf]  ;;  %v1361_v23 = vor.u32 %v1545_v21, %v1360_v20  ;;  %v1362_v24 = vld [vmem:[#allocation5 + $0x258] sm:$0xf0] }
  0x11   :  { %v94_v8 = vpack.c.bf16 %v93_v7, %v93_v7  ;;  %v1368_v25 = vld [vmem:[#allocation5 + $0x238] sm:$0xf]  ;;  %v1546_v26 = vld [vmem:[#allocation5 + $0x25c] sm:$0xf0]  ;;  %v1365_v27 = vor.u32 %v1540_v22, %v1362_v24  ;;  %v1541_v29 = vld [vmem:[#allocation5 + $0x23c] sm:$0xf] }
  0x12   :  { %v1760_v3 = vadd.s32 8, %v1755_v1  ;;  %v74_v4 = vmul.u32 16, %v1757_v2  ;;  %v70_v14 = vadd.s32 16, %v1755_v1  ;;  %v71_v15 = vadd.s32 24, %v1755_v1  ;;  %v1370_v30 = vld [vmem:[#allocation5 + $0x260] sm:$0xf0]  ;;  %642 = vmatpush.bf16.msra.mxu1 %v1361_v23 }
  0x13   :  { %v106_v12 = vsel %vm104_vm4, %v94_v8, 0  ;;  %vm127_vm14 = vcmp.eq.s32.totalorder %v1755_v1, %v1757_v2  ;;  %v1369_v28 = vor.u32 %v1546_v26, %v1368_v25  ;;  %v1320_v31 = vld [vmem:[#allocation5 + $0x1e0] sm:$0xf]  ;;  %v1373_v32 = vor.u32 %v1541_v29, %v1370_v30  ;;  %v1535_v33 = vld [vmem:[#allocation5 + $0x204] sm:$0xf0]  ;;  %661 = vmatpush.bf16.msra.mxu2 %v1365_v27  ;;  %s1715_s12 = smov [#allocation8]  }
  0x14   :  { %vm75_vm0 = vcmp.ge.s32.totalorder %v1755_v1, %v74_v4  ;;  %v79_v5 = vadd.s32 16, %v74_v4  ;;  %vm76_vm1 = vcmp.ge.s32.totalorder %v1760_v3, %v74_v4  ;;  %115 = vmatpush.bf16.msra.mxu0 %v106_v12  ;;  %vm77_vm8 = vcmp.ge.s32.totalorder %v70_v14, %v74_v4  ;;  %v1530_v34 = vld [vmem:[#allocation5 + $0x1e4] sm:$0xf]  ;;  %v1322_v35 = vld [vmem:[#allocation5 + $0x208] sm:$0xf0]  ;;  %s1063_s13 = sshll.u32 %s1715_s12, 4  ;;  %s1064_s13 = int_to_ptr.vmem [resolvable:$true] %s1063_s13 }
  0x15   :  { %vm78_vm10 = vcmp.ge.s32.totalorder %v71_v15, %v74_v4  ;;  %v1771_v19 = vsel %vm127_vm14, 1.0, %v1712_v9  ;;  %680 = vmatpush.bf16.msra.mxu3 %v1369_v28  ;;  %v1321_v37 = vor.u32 %v1535_v33, %v1320_v31  ;;  %v1325_v38 = vor.u32 %v1530_v34, %v1322_v35  ;;  %v1328_v39 = vld [vmem:[#allocation5 + $0x1e8] sm:$0xf]  ;;  %v1536_v40 = vld [vmem:[#allocation5 + $0x20c] sm:$0xf0] }
  0x16   :  { %vm80_vm2 = vcmp.lt.s32.totalorder %v1755_v1, %v79_v5  ;;  %vm81_vm3 = vcmp.lt.s32.totalorder %v1760_v3, %v79_v5  ;;  %vm82_vm9 = vcmp.lt.s32.totalorder %v70_v14, %v79_v5  ;;  %vm83_vm11 = vcmp.lt.s32.totalorder %v71_v15, %v79_v5  ;;  %v1531_v41 = vld [vmem:[#allocation5 + $0x1ec] sm:$0xf]  ;;  %v1330_v44 = vld [vmem:[#allocation5 + $0x210] sm:$0xf0]  ;;  %v1280_v45 = vld [vmem:[#allocation5 + $0x190] sm:$0xf] }
  0x17   :  { %vm84_vm5 = vmand %vm75_vm0, %vm80_vm2  ;;  %vm128_vm0 = vcmp.eq.s32.totalorder %v1760_v3, %v1757_v2  ;;  %v1329_v43 = vor.u32 %v1536_v40, %v1328_v39  ;;  %v1525_v46 = vld [vmem:[#allocation5 + $0x1b4] sm:$0xf0]  ;;  %v1333_v47 = vor.u32 %v1531_v41, %v1330_v44  ;;  %v1520_v48 = vld [vmem:[#allocation5 + $0x194] sm:$0xf]  ;;  %643 = vmatpush.bf16.msra.mxu1 %v1321_v37  ;;  %662 = vmatpush.bf16.msra.mxu2 %v1325_v38  ;;  %vm920_vm14 = vcmp.ge.s32.totalorder %v1757_v2, 8 }
  0x18   :  { %vm85_vm6 = vmand %vm76_vm1, %vm81_vm3  ;;  %v88_v10 = vsel %vm84_vm5, 1.0, %v1712_v9  ;;  %699 = vmatpush.bf16.msrb.mxu0 %v1373_v32  ;;  %v1282_v49 = vld [vmem:[#allocation5 + $0x1b8] sm:$0xf0]  ;;  %v1288_v50 = vld [vmem:[#allocation5 + $0x198] sm:$0xf]  ;;  %v130_v52 = vsel %vm128_vm0, 1.0, %v1712_v9  ;;  %v1281_v53 = vor.u32 %v1525_v46, %v1280_v45 }
  0x19   :  { %v89_v11 = vsel %vm85_vm6, 1.0, %v1712_v9  ;;  %vm86_vm12 = vmand %vm77_vm8, %vm82_vm9  ;;  %v1526_v54 = vld [vmem:[#allocation5 + $0x1bc] sm:$0xf0]  ;;  %v1521_v55 = vld [vmem:[#allocation5 + $0x19c] sm:$0xf]  ;;  %v1285_v56 = vor.u32 %v1520_v48, %v1282_v49  ;;  %681 = vmatpush.bf16.msra.mxu3 %v1329_v43  ;;  %vm895_vm0 = vcmp.lt.s32.totalorder %v1755_v1, 4 }
  0x1a   :  { %v95_v13 = vpack.c.bf16 %v89_v11, %v88_v10  ;;  %vm87_vm13 = vmand %vm78_vm10, %vm83_vm11  ;;  %v90_v16 = vsel %vm86_vm12, 1.0, %v1712_v9  ;;  %v1290_v57 = vld [vmem:[#allocation5 + $0x1c0] sm:$0xf0]  ;;  %v1240_v58 = vld [vmem:[#allocation5 + $0x140] sm:$0xf]  ;;  %v1289_v60 = vor.u32 %v1526_v54, %v1288_v50  ;;  %vm844_vm11 = vcmp.lt.s32.totalorder %v1755_v1, 7 }
  0x1b   :  { %v91_v17 = vsel %vm87_vm13, 1.0, %v1712_v9  ;;  %v1515_v59 = vld [vmem:[#allocation5 + $0x164] sm:$0xf0]  ;;  %v1293_v61 = vor.u32 %v1521_v55, %v1290_v57  ;;  %v1510_v62 = vld [vmem:[#allocation5 + $0x144] sm:$0xf]  ;;  %644 = vmatpush.bf16.msra.mxu1 %v1281_v53  ;;  %663 = vmatpush.bf16.msra.mxu2 %v1285_v56  ;;  %vm861_vm12 = vcmp.lt.s32.totalorder %v1755_v1, 6 }
  0x1c   :  { %1076 = vmatmul.msk.bf16.vlgmr.msra.gmra.mxu0 %vm97_vm7, %v95_v13  ;;  %v96_v18 = vpack.c.bf16 %v91_v17, %v90_v16  ;;  %v1242_v63 = vld [vmem:[#allocation5 + $0x168] sm:$0xf0]  ;;  %v1248_v0 = vld [vmem:[#allocation5 + $0x148] sm:$0xf]  ;;  %v1516_v4 = vld [vmem:[#allocation5 + $0x16c] sm:$0xf0]  ;;  %v1241_v7 = vor.u32 %v1515_v59, %v1240_v58 }
  0x1d   :  { %700 = vmatpush.bf16.msrb.mxu0 %v1333_v47  ;;  %v1511_v5 = vld [vmem:[#allocation5 + $0x14c] sm:$0xf]  ;;  %v1250_v6 = vld [vmem:[#allocation5 + $0x170] sm:$0xf0]  ;;  %v1245_v9 = vor.u32 %v1510_v62, %v1242_v63  ;;  %682 = vmatpush.bf16.msra.mxu3 %v1289_v60  ;;  %v1249_v11 = vor.u32 %v1516_v4, %v1248_v0  ;;  %v1200_v21 = vld [vmem:[#allocation5 + $0xf0] sm:$0xf] }
  0x1e   :  { %v1253_v12 = vor.u32 %v1511_v5, %v1250_v6  ;;  %v1505_v22 = vld [vmem:[#allocation5 + $0x114] sm:$0xf0]  ;;  %v1500_v23 = vld [vmem:[#allocation5 + $0xf4] sm:$0xf]  ;;  %v1202_v25 = vld [vmem:[#allocation5 + $0x118] sm:$0xf0] }
  0x1f   :  { %645 = vmatpush.bf16.msra.mxu1 %v1241_v7  ;;  %664 = vmatpush.bf16.msra.mxu2 %v1245_v9  ;;  %v1201_v24 = vor.u32 %v1505_v22, %v1200_v21  ;;  %v1208_v26 = vld [vmem:[#allocation5 + $0xf8] sm:$0xf]  ;;  %v1506_v27 = vld [vmem:[#allocation5 + $0x11c] sm:$0xf0]  ;;  %v1205_v28 = vor.u32 %v1500_v23, %v1202_v25  ;;  %v1501_v30 = vld [vmem:[#allocation5 + $0xfc] sm:$0xf] }
  0x20   :  { %v1209_v29 = vor.u32 %v1506_v27, %v1208_v26  ;;  %v1210_v31 = vld [vmem:[#allocation5 + $0x120] sm:$0xf0]  ;;  %v1160_v32 = vld [vmem:[#allocation5 + $0xa0] sm:$0xf]  ;;  %v1495_v33 = vld [vmem:[#allocation5 + $0xc4] sm:$0xf0] }
  0x21   :  { %701 = vmatpush.bf16.msrb.mxu0 %v1293_v61  ;;  %683 = vmatpush.bf16.msra.mxu3 %v1249_v11  ;;  %v1490_v34 = vld [vmem:[#allocation5 + $0xa4] sm:$0xf]  ;;  %v1161_v35 = vor.u32 %v1495_v33, %v1160_v32  ;;  %v1168_v37 = vld [vmem:[#allocation5 + $0xa8] sm:$0xf]  ;;  %v1496_v38 = vld [vmem:[#allocation5 + $0xcc] sm:$0xf0] }
  0x22   :  { %v1169_v40 = vor.u32 %v1496_v38, %v1168_v37  ;;  %v1491_v41 = vld [vmem:[#allocation5 + $0xac] sm:$0xf]  ;;  %v1120_v44 = vld [vmem:[#allocation5 + $0x50] sm:$0xf]  ;;  %v1485_v45 = vld [vmem:[#allocation5 + $0x74] sm:$0xf0] }
  0x23   :  { %646 = vmatpush.bf16.msra.mxu1 %v1201_v24  ;;  %665 = vmatpush.bf16.msra.mxu2 %v1205_v28  ;;  %v1480_v46 = vld [vmem:[#allocation5 + $0x54] sm:$0xf]  ;;  %v1121_v47 = vor.u32 %v1485_v45, %v1120_v44  ;;  %v1122_v48 = vld [vmem:[#allocation5 + $0x78] sm:$0xf0]  ;;  %v1128_v49 = vld [vmem:[#allocation5 + $0x58] sm:$0xf] }
  0x24   :  { %v1486_v50 = vld [vmem:[#allocation5 + $0x7c] sm:$0xf0]  ;;  %v1481_v53 = vld [vmem:[#allocation5 + $0x5c] sm:$0xf]  ;;  %v1130_v54 = vld [vmem:[#allocation5 + $0x80] sm:$0xf0] }
  0x25   :  { %702 = vmatpush.bf16.msrb.mxu0 %v1253_v12  ;;  %684 = vmatpush.bf16.msra.mxu3 %v1209_v29  ;;  %v1133_v55 = vor.u32 %v1481_v53, %v1130_v54  ;;  %v1080_v56 = vld [vmem:[#allocation5] sm:$0xf]  ;;  %v1475_v57 = vld [vmem:[#allocation5 + $0x24] sm:$0xf0]  ;;  %v1470_v58 = vld [vmem:[#allocation5 + $0x4] sm:$0xf] }
  0x26   :  { %v1081_v59 = vor.u32 %v1475_v57, %v1080_v56  ;;  %v1082_v60 = vld [vmem:[#allocation5 + $0x28] sm:$0xf0]  ;;  %v1088_v61 = vld [vmem:[#allocation5 + $0x8] sm:$0xf]  ;;  %v1476_v62 = vld [vmem:[#allocation5 + $0x2c] sm:$0xf0] }
  0x27   :  { %647 = vmatpush.bf16.msra.mxu1 %v1161_v35  ;;  %v1085_v63 = vor.u32 %v1470_v58, %v1082_v60  ;;  %v1089_v0 = vor.u32 %v1476_v62, %v1088_v61  ;;  %v1471_v4 = vld [vmem:[#allocation5 + $0xc] sm:$0xf]  ;;  %v1090_v5 = vld [vmem:[#allocation5 + $0x30] sm:$0xf0]  ;;  %v1542_v7 = vld [vmem:[#allocation5 + $0x244] sm:$0xf] }
  0x28   :  { %v1093_v6 = vor.u32 %v1471_v4, %v1090_v5  ;;  %v1547_v11 = vld [vmem:[#allocation5 + $0x264] sm:$0xf0]  ;;  %v1338_v21 = vld [vmem:[#allocation5 + $0x218] sm:$0xf0]  ;;  %v1336_v22 = vld [vmem:[#allocation5 + $0x1f0] sm:$0xf] }
  0x29   :  { %685 = vmatpush.bf16.msra.mxu3 %v1169_v40  ;;  %v1384_v12 = vld [vmem:[#allocation5 + $0x248] sm:$0xf]  ;;  %v1537_v24 = vld [vmem:[#allocation5 + $0x214] sm:$0xf0]  ;;  %v1538_v26 = vld [vmem:[#allocation5 + $0x21c] sm:$0xf0] }
  0x2a   :  { %v1344_v25 = vld [vmem:[#allocation5 + $0x1f8] sm:$0xf]  ;;  %v1337_v27 = vor.u32 %v1537_v24, %v1336_v22  ;;  %v1533_v29 = vld [vmem:[#allocation5 + $0x1fc] sm:$0xf]  ;;  %v1298_v32 = vld [vmem:[#allocation5 + $0x1c8] sm:$0xf0] }
  0x2b   :  { %648 = vmatpush.bf16.msra.mxu1 %v1121_v47  ;;  %v1345_v28 = vor.u32 %v1538_v26, %v1344_v25  ;;  %v1527_v35 = vld [vmem:[#allocation5 + $0x1c4] sm:$0xf0]  ;;  %v1528_v38 = vld [vmem:[#allocation5 + $0x1cc] sm:$0xf0]  ;;  %v1306_v40 = vld [vmem:[#allocation5 + $0x1d0] sm:$0xf0] }
  0x2c   :  { %1077 = vmatmul.msk.bf16.gmra.mxu0 %vm97_vm7, %v96_v18  ;;  %v1258_v44 = vld [vmem:[#allocation5 + $0x178] sm:$0xf0]  ;;  %v1256_v45 = vld [vmem:[#allocation5 + $0x150] sm:$0xf]  ;;  %v1517_v47 = vld [vmem:[#allocation5 + $0x174] sm:$0xf0] }
  0x2d   :  { %v1266_v53 = vld [vmem:[#allocation5 + $0x180] sm:$0xf0]  ;;  %v1218_v56 = vld [vmem:[#allocation5 + $0x128] sm:$0xf0]  ;;  %v1216_v57 = vld [vmem:[#allocation5 + $0x100] sm:$0xf] }
  0x2e   :  { %v1507_v60 = vld [vmem:[#allocation5 + $0x124] sm:$0xf0]  ;;  %v1508_v62 = vld [vmem:[#allocation5 + $0x12c] sm:$0xf0]  ;;  %v1226_v4 = vld [vmem:[#allocation5 + $0x130] sm:$0xf0] }
  0x2f   :  { %649 = vmatpush.bf16.msra.mxu1 %v1081_v59  ;;  %v1224_v61 = vld [vmem:[#allocation5 + $0x108] sm:$0xf]  ;;  %v1136_v24 = vld [vmem:[#allocation5 + $0x60] sm:$0xf]  ;;  %vm878_vm13 = vcmp.lt.s32.totalorder %v1755_v1, 5 }
  0x30   :  { %v1225_v5 = vor.u32 %v1508_v62, %v1224_v61  ;;  %v1487_v25 = vld [vmem:[#allocation5 + $0x84] sm:$0xf0]  ;;  %v1534_v61 = vld [vmem:[#allocation5 + $0x204] sm:$0xf]  ;;  %v1354_v62 = vld [vmem:[#allocation5 + $0x228] sm:$0xf0] }
  0x99   :  { %v117_v36 = vpop.f32.mrf.mxu0 }
  0x9a   :  { %v131_v42 = vmul.f32 %v1771_v19, %v117_v36  ;;  %v1162_v36 = vld [vmem:[#allocation5 + $0xc8] sm:$0xf0] }
  0x9b   :  { %v1165_v39 = vor.u32 %v1490_v34, %v1162_v36  ;;  %v1296_v34 = vld [vmem:[#allocation5 + $0x1a0] sm:$0xf]  ;;  %v1304_v36 = vld [vmem:[#allocation5 + $0x1a8] sm:$0xf] }
  0x9c   :  { %v136_v51 = vsel %vm135_vm15, %v131_v42, 0.0  ;;  %v1170_v42 = vld [vmem:[#allocation5 + $0xd0] sm:$0xf0]  ;;  %v1297_v37 = vor.u32 %v1527_v35, %v1296_v34 }
  0x9d   :  { %137 = vadd.xlane.f32.xlu0 %v136_v51  ;;  %v1173_v43 = vor.u32 %v1491_v41, %v1170_v42  ;;  %666 = vmatpush.bf16.msra.mxu2 %v1165_v39  ;;  %v1125_v51 = vor.u32 %v1480_v46, %v1122_v48  ;;  %v1523_v39 = vld [vmem:[#allocation5 + $0x1ac] sm:$0xf]  ;;  %v1305_v41 = vor.u32 %v1528_v38, %v1304_v36  ;;  %v1264_v48 = vld [vmem:[#allocation5 + $0x158] sm:$0xf] }
  0x9e   :  { %v1309_v42 = vor.u32 %v1523_v39, %v1306_v40  ;;  %v1477_v38 = vld [vmem:[#allocation5 + $0x34] sm:$0xf0] }
  0xa1   :  { %v119_v8 = vpop.f32.mrf.mxu0  ;;  %667 = vmatpush.bf16.msra.mxu2 %v1125_v51 }
  0xa2   :  { %v132_v10 = vmul.f32 %v130_v52, %v119_v8  ;;  %v1378_v8 = vld [vmem:[#allocation5 + $0x268] sm:$0xf0] }
  0xa3   :  { %v1381_v9 = vor.u32 %v1542_v7, %v1378_v8  ;;  %v1492_v7 = vld [vmem:[#allocation5 + $0xb4] sm:$0xf]  ;;  %v1178_v8 = vld [vmem:[#allocation5 + $0xd8] sm:$0xf0] }
  0xa4   :  { %v139_v13 = vsel %vm135_vm15, %v132_v10, 0.0  ;;  %v1376_v10 = vld [vmem:[#allocation5 + $0x240] sm:$0xf] }
  0xa5   :  { %140 = vadd.xlane.f32.xlu0 %v139_v13  ;;  %668 = vmatpush.bf16.msra.mxu2 %v1085_v63  ;;  %v1377_v13 = vor.u32 %v1547_v11, %v1376_v10  ;;  %v1217_v63 = vor.u32 %v1507_v60, %v1216_v57 }
  0xa7   :  { %718 = vmatpush.bf16.msrb.mxu1 %v1377_v13  ;;  %v1497_v13 = vld [vmem:[#allocation5 + $0xd4] sm:$0xf0] }
  0xa9   :  { %v122_v14 = vpop.f32.mrf.mxu0  ;;  %737 = vmatpush.bf16.msrb.mxu2 %v1381_v9  ;;  %v1176_v9 = vld [vmem:[#allocation5 + $0xb0] sm:$0xf] }
  0xaa   :  { %v133_v15 = vmul.f32 %v1771_v19, %v122_v14  ;;  %v1213_v19 = vor.u32 %v1501_v30, %v1210_v31  ;;  %v1548_v14 = vld [vmem:[#allocation5 + $0x26c] sm:$0xf0]  ;;  %v1346_v30 = vld [vmem:[#allocation5 + $0x220] sm:$0xf0] }
  0xab   :  { %v1349_v31 = vor.u32 %v1533_v29, %v1346_v30  ;;  %719 = vmatpush.bf16.msrb.mxu1 %v1337_v27  ;;  %v1144_v27 = vld [vmem:[#allocation5 + $0x68] sm:$0xf]  ;;  %v1483_v29 = vld [vmem:[#allocation5 + $0x6c] sm:$0xf] }
  0xac   :  { %v142_v16 = vsel %vm135_vm15, %v133_v15, 0.0  ;;  %703 = vmatpush.bf16.msrb.mxu0 %v1213_v19  ;;  %v1543_v15 = vld [vmem:[#allocation5 + $0x24c] sm:$0xf]  ;;  %v1522_v19 = vld [vmem:[#allocation5 + $0x1a4] sm:$0xf] }
  0xad   :  { %143 = vadd.xlane.f32.xlu1 %v142_v16  ;;  %v1386_v16 = vld [vmem:[#allocation5 + $0x270] sm:$0xf0]  ;;  %v1301_v33 = vor.u32 %v1522_v19, %v1298_v32 }
  0xae   :  { %v1146_v19 = vld [vmem:[#allocation5 + $0x90] sm:$0xf0] }
  0xaf   :  { %720 = vmatpush.bf16.msrb.mxu1 %v1297_v37  ;;  %v1472_v32 = vld [vmem:[#allocation5 + $0x14] sm:$0xf]  ;;  %v1149_v36 = vor.u32 %v1483_v29, %v1146_v19  ;;  %v1096_v37 = vld [vmem:[#allocation5 + $0x10] sm:$0xf] }
  0xb0   :  { %704 = vmatpush.bf16.msrb.mxu0 %v1173_v43  ;;  %v1512_v43 = vld [vmem:[#allocation5 + $0x154] sm:$0xf]  ;;  %v1232_v19 = vld [vmem:[#allocation5 + $0x110] sm:$0xf] }
  0xb1   :  { %v124_v17 = vpop.f32.mrf.mxu0  ;;  %v1261_v46 = vor.u32 %v1512_v43, %v1258_v44  ;;  %v1104_v43 = vld [vmem:[#allocation5 + $0x18] sm:$0xf]  ;;  %v1504_v29 = vld [vmem:[#allocation5 + $0x114] sm:$0xf] }
  0xb2   :  { %v134_v18 = vmul.f32 %v130_v52, %v124_v17  ;;  %v1129_v52 = vor.u32 %v1486_v50, %v1128_v49  ;;  %v1385_v17 = vor.u32 %v1548_v14, %v1384_v12  ;;  %v1518_v49 = vld [vmem:[#allocation5 + $0x17c] sm:$0xf0]  ;;  %v1257_v50 = vor.u32 %v1517_v47, %v1256_v45  ;;  %v1184_v14 = vld [vmem:[#allocation5 + $0xb8] sm:$0xf]  ;;  %v1473_v47 = vld [vmem:[#allocation5 + $0x1c] sm:$0xf] }
  0xb3   :  { %v1265_v51 = vor.u32 %v1518_v49, %v1264_v48  ;;  %v1181_v12 = vor.u32 %v1492_v7, %v1178_v8  ;;  %v1097_v45 = vor.u32 %v1477_v38, %v1096_v37  ;;  %v1106_v48 = vld [vmem:[#allocation5 + $0x40] sm:$0xf0]  ;;  %v1524_v8 = vld [vmem:[#allocation5 + $0x1b4] sm:$0xf]  ;;  %v1499_v37 = vld [vmem:[#allocation5 + $0xe4] sm:$0xf0] }
  0xb4   :  { %v145_v20 = vsel %vm135_vm15, %v134_v18, 0.0  ;;  %686 = vmatpush.bf16.msra.mxu3 %v1129_v52  ;;  %705 = vmatpush.bf16.msrb.mxu0 %v1133_v55  ;;  %v1389_v18 = vor.u32 %v1543_v15, %v1386_v16  ;;  %v1513_v52 = vld [vmem:[#allocation5 + $0x15c] sm:$0xf]  ;;  %v1502_v55 = vld [vmem:[#allocation5 + $0x104] sm:$0xf]  ;;  %v1177_v16 = vor.u32 %v1497_v13, %v1176_v9  ;;  %vm921_vm15 = vcmp.lt.s32.totalorder %v1757_v2, 16 }
  0xb5   :  { %146 = vadd.xlane.f32.xlu1 %v145_v20  ;;  %v1532_v20 = vld [vmem:[#allocation5 + $0x1f4] sm:$0xf]  ;;  %v1269_v54 = vor.u32 %v1513_v52, %v1266_v53  ;;  %721 = vmatpush.bf16.msrb.mxu1 %v1257_v50  ;;  %v1221_v59 = vor.u32 %v1502_v55, %v1218_v56  ;;  %v1498_v15 = vld [vmem:[#allocation5 + $0xdc] sm:$0xf0]  ;;  %v1713_v55 = vmov 1.0|1.0  }
  0xb6   :  { %v1341_v23 = vor.u32 %v1532_v20, %v1338_v21  ;;  %v1186_v20 = vld [vmem:[#allocation5 + $0xe0] sm:$0xf0]  ;;  %v1544_v53 = vld [vmem:[#allocation5 + $0x254] sm:$0xf]  ;;  %v1314_v9 = vld [vmem:[#allocation5 + $0x1d8] sm:$0xf0] }
  0xb7   :  { %v1482_v21 = vld [vmem:[#allocation5 + $0x64] sm:$0xf]  ;;  %v1317_v13 = vor.u32 %v1524_v8, %v1314_v9 }
  0xb8   :  { %687 = vmatpush.bf16.msra.mxu3 %v1089_v0  ;;  %706 = vmatpush.bf16.msrb.mxu0 %v1093_v6  ;;  %v1503_v0 = vld [vmem:[#allocation5 + $0x10c] sm:$0xf] }
  0xb9   :  { %738 = vmatpush.bf16.msrb.mxu2 %v1341_v23  ;;  %v1229_v6 = vor.u32 %v1503_v0, %v1226_v4  ;;  %722 = vmatpush.bf16.msrb.mxu1 %v1217_v63  ;;  %v1138_v23 = vld [vmem:[#allocation5 + $0x88] sm:$0xf0]  ;;  %v1352_v63 = vld [vmem:[#allocation5 + $0x200] sm:$0xf]  ;;  %v1539_v0 = vld [vmem:[#allocation5 + $0x224] sm:$0xf0] }
  0xba   :  { %v1141_v26 = vor.u32 %v1482_v21, %v1138_v23  ;;  %v1353_v7 = vor.u32 %v1539_v0, %v1352_v63 }
  0xbc   :  { %756 = vmatpush.bf16.msrb.mxu3 %v1385_v17  ;;  %775 = vmatpush.bf16.msra.mxu0 %v1389_v18  ;;  %v1185_v17 = vor.u32 %v1498_v15, %v1184_v14  ;;  %v1493_v18 = vld [vmem:[#allocation5 + $0xbc] sm:$0xf]  ;;  %v1514_v15 = vld [vmem:[#allocation5 + $0x164] sm:$0xf] }
  0xbd   :  { %739 = vmatpush.bf16.msrb.mxu2 %v1301_v33  ;;  %v1189_v22 = vor.u32 %v1493_v18, %v1186_v20  ;;  %723 = vmatpush.bf16.msrb.mxu1 %v1177_v16  ;;  %v1098_v33 = vld [vmem:[#allocation5 + $0x38] sm:$0xf0]  ;;  %v1272_v18 = vld [vmem:[#allocation5 + $0x160] sm:$0xf]  ;;  %v1519_v20 = vld [vmem:[#allocation5 + $0x184] sm:$0xf0] }
  0xc0   :  { %757 = vmatpush.bf16.msrb.mxu3 %v1345_v28  ;;  %776 = vmatpush.bf16.msra.mxu0 %v1349_v31  ;;  %v1488_v28 = vld [vmem:[#allocation5 + $0x8c] sm:$0xf0]  ;;  %v1137_v31 = vor.u32 %v1487_v25, %v1136_v24 }
  0xc1   :  { %740 = vmatpush.bf16.msrb.mxu2 %v1261_v46  ;;  %v1145_v35 = vor.u32 %v1488_v28, %v1144_v27  ;;  %v1478_v46 = vld [vmem:[#allocation5 + $0x3c] sm:$0xf0] }
  0xc2   :  { %724 = vmatpush.bf16.msrb.mxu1 %v1137_v31  ;;  %v1105_v50 = vor.u32 %v1478_v46, %v1104_v43  ;;  %v1489_v43 = vld [vmem:[#allocation5 + $0x94] sm:$0xf0]  ;;  %v1474_v46 = vld [vmem:[#allocation5 + $0x24] sm:$0xf] }
  0xc4   :  { %758 = vmatpush.bf16.msrb.mxu3 %v1305_v41  ;;  %777 = vmatpush.bf16.msra.mxu0 %v1309_v42  ;;  %v1101_v42 = vor.u32 %v1472_v32, %v1098_v33  ;;  %v1509_v32 = vld [vmem:[#allocation5 + $0x134] sm:$0xf0] }
  0xc5   :  { %741 = vmatpush.bf16.msrb.mxu2 %v1221_v59  ;;  %v1549_v59 = vld [vmem:[#allocation5 + $0x274] sm:$0xf0]  ;;  %v1233_v33 = vor.u32 %v1509_v32, %v1232_v19 }
  0xc6   :  { %725 = vmatpush.bf16.msrb.mxu1 %v1097_v45 }
  0xc8   :  { %759 = vmatpush.bf16.msrb.mxu3 %v1265_v51  ;;  %778 = vmatpush.bf16.msra.mxu0 %v1269_v54  ;;  %v1109_v51 = vor.u32 %v1473_v47, %v1106_v48  ;;  %v1394_v54 = vld [vmem:[#allocation5 + $0x278] sm:$0xf0]  ;;  %v1114_v47 = vld [vmem:[#allocation5 + $0x48] sm:$0xf0]  ;;  %v1112_v48 = vld [vmem:[#allocation5 + $0x20] sm:$0xf] }
  0xc9   :  { %742 = vmatpush.bf16.msrb.mxu2 %v1181_v12  ;;  %v1397_v57 = vor.u32 %v1544_v53, %v1394_v54 }
  0xcc   :  { %760 = vmatpush.bf16.msrb.mxu3 %v1225_v5  ;;  %779 = vmatpush.bf16.msra.mxu0 %v1229_v6  ;;  %v1357_v6 = vor.u32 %v1534_v61, %v1354_v62 }
  0xcd   :  { %743 = vmatpush.bf16.msrb.mxu2 %v1141_v26  ;;  %v1273_v26 = vor.u32 %v1519_v20, %v1272_v18 }
  0xd0   :  { %761 = vmatpush.bf16.msrb.mxu3 %v1185_v17  ;;  %780 = vmatpush.bf16.msra.mxu0 %v1189_v22  ;;  %v1274_v17 = vld [vmem:[#allocation5 + $0x188] sm:$0xf0] }
  0xd1   :  { %744 = vmatpush.bf16.msrb.mxu2 %v1101_v42  ;;  %v1277_v25 = vor.u32 %v1514_v15, %v1274_v17  ;;  %v1152_v42 = vld [vmem:[#allocation5 + $0x70] sm:$0xf] }
  0xd2   :  { %v1153_v45 = vor.u32 %v1489_v43, %v1152_v42  ;;  %v1556_v42 = vld [vmem:[#allocation7 + $0x30] sm:$0xff] }
  0xd4   :  { %762 = vmatpush.bf16.msrb.mxu3 %v1145_v35  ;;  %781 = vmatpush.bf16.msra.mxu0 %v1149_v36  ;;  %v1194_v35 = vld [vmem:[#allocation5 + $0xe8] sm:$0xf0]  ;;  %v1192_v36 = vld [vmem:[#allocation5 + $0xc0] sm:$0xf] }
  0xd8   :  { %763 = vmatpush.bf16.msrb.mxu3 %v1105_v50  ;;  %782 = vmatpush.bf16.msra.mxu0 %v1109_v51  ;;  %v1117_v50 = vor.u32 %v1474_v46, %v1114_v47 }
 0x110   :  { %v138_v58 = vpop.xlane.xlu0 %137 }
 0x111   :  { %vm1566_vm1 = vcmp.lt.s32.totalorder %v138_v58, 0  ;;  %v1567_v10 = vceil.f32 %v138_v58  ;;  %v1568_v11 = vfloor.f32 %v138_v58  ;;  %v1392_v58 = vld [vmem:[#allocation5 + $0x250] sm:$0xf] }
 0x112   :  { %v1393_v60 = vor.u32 %v1549_v59, %v1392_v58 }
 0x113   :  { %v1569_v30 = vsel %vm1566_vm1, %v1567_v10, %v1568_v11  ;;  %v1312_v10 = vld [vmem:[#allocation5 + $0x1b0] sm:$0xf]  ;;  %v1529_v11 = vld [vmem:[#allocation5 + $0x1d4] sm:$0xf0]  ;;  %vm917_vm1 = vcmp.lt.s32.totalorder %v1757_v2, 8 }
 0x114   :  { %v1570_v41 = vcvt.f32.s32 %v1569_v30  ;;  %v1313_v14 = vor.u32 %v1529_v11, %v1312_v10  ;;  %v1234_v30 = vld [vmem:[#allocation5 + $0x138] sm:$0xf0] }
 0x115   :  { %v1237_v31 = vor.u32 %v1504_v29, %v1234_v30 }
 0x116   :  { %vm152_vm3 = vcmp.eq.s32.totalorder %v1570_v41, %v1757_v2  ;;  %v1154_v41 = vld [vmem:[#allocation5 + $0x98] sm:$0xf0] }
 0x118   :  { %v141_v34 = vpop.xlane.xlu0 %140 }
 0x119   :  { %vm1571_vm2 = vcmp.lt.s32.totalorder %v141_v34, 0  ;;  %v1572_v39 = vceil.f32 %v141_v34  ;;  %v1573_v40 = vfloor.f32 %v141_v34  ;;  %v1494_v34 = vld [vmem:[#allocation5 + $0xc4] sm:$0xf] }
 0x11a   :  { %v1197_v38 = vor.u32 %v1494_v34, %v1194_v35  ;;  %v1557_v35 = vld [vmem:[#allocation7 + $0x38] sm:$0xff] }
 0x11b   :  { %v1574_v44 = vsel %vm1571_vm2, %v1572_v39, %v1573_v40  ;;  %v1193_v39 = vor.u32 %v1499_v37, %v1192_v36  ;;  %v1484_v40 = vld [vmem:[#allocation5 + $0x74] sm:$0xf]  ;;  %vm922_vm2 = vmand %vm920_vm14, %vm921_vm15 }
 0x11c   :  { %v1575_v49 = vcvt.f32.s32 %v1574_v44  ;;  %v1157_v44 = vor.u32 %v1484_v40, %v1154_v41 }
 0x11e   :  { %vm153_vm4 = vcmp.eq.s32.totalorder %v1575_v49, %v1757_v2  ;;  %v1479_v49 = vld [vmem:[#allocation5 + $0x44] sm:$0xf0] }
 0x11f   :  { %vm1787_vm5 = vmpackc.low %vm153_vm4, %vm152_vm3  ;;  %v1113_v51 = vor.u32 %v1479_v49, %v1112_v48  ;;  %vm925_vm3 = vcmp.ge.s32.totalorder %v1757_v2, 16  ;;  %vm926_vm4 = vcmp.lt.s32.totalorder %v1757_v2, 24 }
 0x120   :  { %1399 = vmatmul.msk.bf16.vlgmr.msra.gmra.mxu1 %vm1787_vm5, %v1713_v55  ;;  %1403 = vmatmul.msk.bf16.vlgmr.msra.gmra.mxu2 %vm1787_vm5, %v1713_v55  ;;  %v144_v56 = vpop.xlane.xlu1 %143 }
 0x121   :  { %1407 = vmatmul.msk.bf16.vlgmr.msra.gmra.mxu3 %vm1787_vm5, %v1713_v55  ;;  %1411 = vmatmul.msk.bf16.vlgmr.msrb.gmra.mxu0 %vm1787_vm5, %v1713_v55  ;;  %vm1576_vm6 = vcmp.lt.s32.totalorder %v144_v56, 0  ;;  %v1577_v4 = vceil.f32 %v144_v56  ;;  %v1578_v5 = vfloor.f32 %v144_v56 }
 0x122   :  { %813 = vmatpush.bf16.msra.mxu2 %v1397_v57  ;;  %794 = vmatpush.bf16.msrb.mxu0 %v1393_v60 }
 0x123   :  { %1558 = vmatpush.bf16.msra.mxu1 %v1393_v60  ;;  %v1579_v12 = vsel %vm1576_vm6, %v1577_v4, %v1578_v5  ;;  %1032 = vmatpush.bf16.msra.mxu3 %v1557_v35  ;;  %v1597_v35 = vld [vmem:[%s1982_s2] ss:$0 sm:$0xff] }
 0x124   :  { %v1580_v23 = vcvt.f32.s32 %v1579_v12 }
 0x126   :  { %814 = vmatpush.bf16.msra.mxu2 %v1357_v6  ;;  %795 = vmatpush.bf16.msrb.mxu0 %v1353_v7  ;;  %vm154_vm8 = vcmp.eq.s32.totalorder %v1580_v23, %v1757_v2 }
 0x127   :  { %1559 = vmatpush.bf16.msra.mxu1 %v1353_v7  ;;  %1033 = vmatpush.bf16.msra.mxu3 %v1556_v42 }
 0x128   :  { %v147_v16 = vpop.xlane.xlu1 %146 }
 0x129   :  { %vm1581_vm7 = vcmp.lt.s32.totalorder %v147_v16, 0  ;;  %v1582_v21 = vceil.f32 %v147_v16  ;;  %v1583_v22 = vfloor.f32 %v147_v16 }
 0x12a   :  { %815 = vmatpush.bf16.msra.mxu2 %v1317_v13  ;;  %796 = vmatpush.bf16.msrb.mxu0 %v1313_v14 }
 0x12b   :  { %v1584_v24 = vsel %vm1581_vm7, %v1582_v21, %v1583_v22  ;;  %1560 = vmatpush.bf16.msra.mxu1 %v1313_v14 }
 0x12c   :  { %v1585_v27 = vcvt.f32.s32 %v1584_v24 }
 0x12e   :  { %vm155_vm9 = vcmp.eq.s32.totalorder %v1585_v27, %v1757_v2  ;;  %816 = vmatpush.bf16.msra.mxu2 %v1277_v25  ;;  %797 = vmatpush.bf16.msrb.mxu0 %v1273_v26 }
 0x12f   :  { %vm1806_vm10 = vmpackc.low %vm155_vm9, %vm154_vm8  ;;  %1561 = vmatpush.bf16.msra.mxu1 %v1273_v26  ;;  %vm980_vm8 = vcmask 1041409   ;;  %vm1045_vm9 = vcmask 1041408  }
 0x130   :  { %1401 = vmatmul.msk.bf16.gmra.mxu1 %vm1806_vm10, %v1713_v55  ;;  %1405 = vmatmul.msk.bf16.gmra.mxu2 %vm1806_vm10, %v1713_v55 }
 0x131   :  { %1409 = vmatmul.msk.bf16.gmra.mxu3 %vm1806_vm10, %v1713_v55  ;;  %1413 = vmatmul.msk.bf16.gmra.mxu0 %vm1806_vm10, %v1713_v55 }
 0x132   :  { %817 = vmatpush.bf16.msra.mxu2 %v1237_v31  ;;  %798 = vmatpush.bf16.msrb.mxu0 %v1233_v33 }
 0x133   :  { %1562 = vmatpush.bf16.msra.mxu1 %v1233_v33 }
 0x136   :  { %818 = vmatpush.bf16.msra.mxu2 %v1197_v38  ;;  %799 = vmatpush.bf16.msrb.mxu0 %v1193_v39 }
 0x137   :  { %1563 = vmatpush.bf16.msra.mxu1 %v1193_v39 }
 0x13a   :  { %819 = vmatpush.bf16.msra.mxu2 %v1157_v44  ;;  %800 = vmatpush.bf16.msrb.mxu0 %v1153_v45 }
 0x13b   :  { %1564 = vmatpush.bf16.msra.mxu1 %v1153_v45 }
 0x13e   :  { %820 = vmatpush.bf16.msra.mxu2 %v1117_v50  ;;  %801 = vmatpush.bf16.msrb.mxu0 %v1113_v51 }
 0x13f   :  { %1565 = vmatpush.bf16.msra.mxu1 %v1113_v51 }
 0x140   :  { %1415 = vmatmul.msk.bf16.vlgmr.msrb.gmra.mxu1 %vm1787_vm5, %v1713_v55  ;;  %1419 = vmatmul.msk.bf16.vlgmr.msrb.gmra.mxu2 %vm1787_vm5, %v1713_v55 }
 0x141   :  { %1423 = vmatmul.msk.bf16.vlgmr.msrb.gmra.mxu3 %vm1787_vm5, %v1713_v55  ;;  %1427 = vmatmul.msk.bf16.vlgmr.msra.gmra.mxu0 %vm1787_vm5, %v1713_v55 }
 0x150   :  { %1417 = vmatmul.msk.bf16.gmra.mxu1 %vm1806_vm10, %v1713_v55  ;;  %1421 = vmatmul.msk.bf16.gmra.mxu2 %vm1806_vm10, %v1713_v55 }
 0x151   :  { %1425 = vmatmul.msk.bf16.gmra.mxu3 %vm1806_vm10, %v1713_v55  ;;  %1429 = vmatmul.msk.bf16.gmra.mxu0 %vm1806_vm10, %v1713_v55 }
 0x160   :  { %1433 = vmatmul.msk.bf16.vlgmr.msra.gmra.mxu1 %vm1806_vm10, %v1713_v55  ;;  %1435 = vmatmul.msk.bf16.vlgmr.msra.gmra.mxu2 %vm1787_vm5, %v1713_v55 }
 0x161   :  { %1431 = vmatmul.msk.bf16.vlgmr.msrb.gmra.mxu0 %vm1787_vm5, %v1713_v55  ;;  %vm927_vm5 = vmand %vm925_vm3, %vm926_vm4 }
 0x170   :  { %1437 = vmatmul.msk.bf16.gmra.mxu2 %vm1806_vm10, %v1713_v55 }
 0x19d   :  { %v651_v53 = vpop.f32.mrf.mxu1 }
 0x19e   :  { %v708_v54 = vpop.f32.mrf.mxu0 }
 0x1a3   :  { %v670_v56 = vpop.f32.mrf.mxu2 }
 0x1a4   :  { %v689_v57 = vpop.f32.mrf.mxu3 }
 0x1a5   :  { %v653_v58 = vpop.f32.mrf.mxu1 }
 0x1a6   :  { %v1858_v59 = vpop.f32.mrf.mxu0 }
 0x1ab   :  { %v672_v60 = vpop.f32.mrf.mxu2 }
 0x1ac   :  { %v691_v61 = vpop.f32.mrf.mxu3 }
 0x1ad   :  { %v1860_v62 = vpop.f32.mrf.mxu1 }
 0x1ae   :  { %v713_v63 = vpop.f32.mrf.mxu0 }
 0x1b3   :  { %v675_v0 = vpop.f32.mrf.mxu2 }
 0x1b4   :  { %v694_v4 = vpop.f32.mrf.mxu3 }
 0x1b5   :  { %v658_v52 = vpop.f32.mrf.mxu1 }
 0x1b6   :  { %v715_v5 = vpop.f32.mrf.mxu0 }
 0x1bb   :  { %v677_v6 = vpop.f32.mrf.mxu2 }
 0x1bc   :  { %v696_v7 = vpop.f32.mrf.mxu3 }
 0x1bd   :  { %v1862_v8 = vpop.f32.mrf.mxu1 }
 0x1be   :  { %v784_v55 = vpop.f32.mrf.mxu0 }
 0x1bf   :  { %v853_v40 = vadd.f32 %v784_v55, %v689_v57 }
 0x1c1   :  { %v857_v50 = vrot.slane %v853_v40, 2  ;;  %v1551_v40 = vld [vmem:[#allocation7 + $0x8] sm:$0xff] }
 0x1c3   :  { %v746_v9 = vpop.f32.mrf.mxu2 }
 0x1c4   :  { %v765_v10 = vpop.f32.mrf.mxu3  ;;  %v832_v22 = vadd.f32 %v746_v9, %v651_v53  ;;  %v1554_v9 = vld [vmem:[#allocation7 + $0x20] sm:$0xff] }
 0x1c5   :  { %v1864_v11 = vpop.f32.mrf.mxu1  ;;  %v836_v13 = vadd.f32 %v765_v10, %v670_v56 }
 0x1c6   :  { %v786_v12 = vpop.f32.mrf.mxu0 }
 0x1c7   :  { %v840_v20 = vrot.slane %v836_v13, 1  ;;  %v854_v37 = vadd.f32 %v786_v12, %v691_v61 }
 0x1c9   :  { %v858_v44 = vrot.slane %v854_v37, 2 }
 0x1cb   :  { %v748_v14 = vpop.f32.mrf.mxu2 }
 0x1cc   :  { %v767_v15 = vpop.f32.mrf.mxu3  ;;  %v833_v47 = vadd.f32 %v748_v14, %v653_v58 }
 0x1cd   :  { %v837_v16 = vadd.f32 %v767_v15, %v672_v60  ;;  %v1866_v17 = vpop.f32.mrf.mxu1  ;;  %v1555_v60 = vld [vmem:[#allocation7 + $0x28] sm:$0xff] }
 0x1ce   :  { %v789_v18 = vpop.f32.mrf.mxu0  ;;  %1034 = vmatpush.bf16.msra.mxu3 %v1555_v60 }
 0x1cf   :  { %v841_v21 = vrot.slane %v837_v16, 1  ;;  %v1887_v41 = vadd.f32 %v789_v18, %v694_v4 }
 0x1d1   :  { %v847_v23 = vsel %vm844_vm11, %v840_v20, %v841_v21  ;;  %v859_v51 = vrot.slane %v1887_v41, 2 }
 0x1d2   :  { %v849_v24 = vadd.f32 %v847_v23, %v832_v22  ;;  %1035 = vmatpush.bf16.msra.mxu3 %v1554_v9 }
 0x1d3   :  { %v1871_v25 = vpop.f32.mrf.mxu2 }
 0x1d4   :  { %v770_v26 = vpop.f32.mrf.mxu3 }
 0x1d5   :  { %v1873_v27 = vadd.f32 %v770_v26, %v675_v0  ;;  %v1875_v28 = vpop.f32.mrf.mxu1 }
 0x1d6   :  { %v791_v29 = vpop.f32.mrf.mxu0 }
 0x1d7   :  { %v842_v30 = vrot.slane %v1873_v27, 1  ;;  %v1885_v39 = vadd.f32 %v791_v29, %v696_v7  ;;  %v1552_v29 = vld [vmem:[#allocation7 + $0x10] sm:$0xff] }
 0x1d9   :  { %v846_v31 = vsel %vm844_vm11, %v841_v21, %v842_v30  ;;  %v860_v48 = vrot.slane %v1885_v39, 2 }
 0x1da   :  { %v850_v61 = vadd.f32 %v846_v31, %v833_v47  ;;  %v1714_v31 = vmov 0  }
 0x1db   :  { %v753_v19 = vpop.f32.mrf.mxu2  ;;  %v928_v42 = vsel %vm927_vm5, 12, %v1714_v31 }
 0x1dc   :  { %v772_v32 = vpop.f32.mrf.mxu3  ;;  %v835_v45 = vadd.f32 %v753_v19, %v658_v52  ;;  %v864_v52 = vsel %vm861_vm12, %v857_v50, %v858_v44  ;;  %v919_v19 = vsel %vm917_vm1, 14, %v1714_v31 }
 0x1dd   :  { %v1882_v33 = vadd.f32 %v772_v32, %v677_v6  ;;  %v808_v34 = vpop.f32.mrf.mxu1  ;;  %v866_v12 = vadd.f32 %v864_v52, %v849_v24  ;;  %v923_v32 = vsel %vm922_vm2, 13, %v1714_v31 }
 0x1de   :  { %v803_v36 = vpop.f32.mrf.mxu0  ;;  %v1896_v56 = vadd.f32 %v808_v34, %v713_v63 }
 0x1df   :  { %v843_v38 = vrot.slane %v1882_v33, 1  ;;  %v870_v49 = vadd.f32 %v803_v36, %v708_v54  ;;  %v865_v54 = vsel %vm861_vm12, %v860_v48, %v857_v50  ;;  %v924_v36 = vadd.s32 %v923_v32, %v919_v19 }
 0x1e1   :  { %v848_v43 = vsel %vm844_vm11, %v843_v38, %v840_v20  ;;  %v874_v63 = vrot.slane %v870_v49, 3  ;;  %v929_v47 = vadd.s32 %v928_v42, %v924_v36  ;;  %v1550_v49 = vld [vmem:[#allocation7] sm:$0xff] }
 0x1e2   :  { %v852_v53 = vadd.f32 %v848_v43, %v835_v45  ;;  %v845_v43 = vsel %vm844_vm11, %v842_v30, %v843_v38  ;;  %v834_v45 = vadd.f32 %v1871_v25, %v1860_v62  ;;  %v862_v62 = vsel %vm861_vm12, %v859_v51, %v860_v48 }
 0x1e3   :  { %v822_v46 = vpop.f32.mrf.mxu2  ;;  %vm930_vm6 = vcmp.lt.s32.totalorder %v1755_v1, %v929_v47  ;;  %vm931_vm7 = vcmp.lt.s32.totalorder %v1760_v3, %v929_v47  ;;  %v1598_v3 = vld [vmem:[%s1984_s4] ss:$0 sm:$0xff]  ;;  %s1065_s4 = sshll.u32 %s1985_s5, 4  ;;  %s1066_s4 = int_to_ptr.hbm [resolvable:$true] %s1065_s4 }
 0x1e4   :  { %v869_v55 = vadd.f32 %v865_v54, %v852_v53  ;;  %v1917_v10 = vadd.f32 %v822_v46, %v1862_v8  ;;  %v1553_v8 = vld [vmem:[#allocation7 + $0x18] sm:$0xff]  ;;  %v851_v53 = vadd.f32 %v845_v43, %v834_v45 }
 0x1e5   :  { %v810_v57 = vpop.f32.mrf.mxu1  ;;  %1036 = vmatpush.bf16.msra.mxu3 %v1553_v8 }
 0x1e6   :  { %v805_v0 = vpop.f32.mrf.mxu0  ;;  %v1898_v4 = vadd.f32 %v810_v57, %v715_v5  ;;  %v876_v5 = vrot.slane %v1896_v56, 3  ;;  %v891_v24 = vrot.slane %v1917_v10, 4  ;;  %v868_v38 = vadd.f32 %v862_v62, %v851_v53 }
 0x1e7   :  { %v871_v58 = vadd.f32 %v805_v0, %v1858_v59  ;;  %v863_v59 = vsel %vm861_vm12, %v858_v44, %v859_v51 }
 0x1e8   :  { %v877_v6 = vrot.slane %v1898_v4, 3  ;;  %v867_v13 = vadd.f32 %v863_v59, %v850_v61 }
 0x1e9   :  { %v875_v7 = vrot.slane %v871_v58, 3  ;;  %1037 = vmatpush.bf16.msra.mxu3 %v1552_v29 }
 0x1ea   :  { %v882_v14 = vsel %vm878_vm13, %v877_v6, %v874_v63  ;;  %v879_v25 = vsel %vm878_vm13, %v876_v5, %v877_v6 }
 0x1eb   :  { %v880_v15 = vsel %vm878_vm13, %v875_v7, %v876_v5  ;;  %v881_v16 = vsel %vm878_vm13, %v874_v63, %v875_v7  ;;  %v886_v18 = vadd.f32 %v882_v14, %v869_v55  ;;  %v824_v20 = vpop.f32.mrf.mxu2  ;;  %v885_v61 = vadd.f32 %v879_v25, %v868_v38 }
 0x1ec   :  { %v883_v21 = vadd.f32 %v881_v16, %v866_v12  ;;  %v884_v22 = vadd.f32 %v880_v15, %v867_v13  ;;  %v888_v23 = vadd.f32 %v824_v20, %v1864_v11 }
 0x1ed   :  { %1038 = vmatpush.bf16.msra.mxu3 %v1551_v40 }
 0x1ee   :  { %v892_v26 = vrot.slane %v888_v23, 4 }
 0x1f0   :  { %v898_v11 = vsel %vm895_vm0, %v891_v24, %v892_v26 }
 0x1f1   :  { %v900_v34 = vadd.f32 %v898_v11, %v883_v21  ;;  %1039 = vmatpush.bf16.msra.mxu3 %v1550_v49 }
 0x1f3   :  { %v827_v37 = vpop.f32.mrf.mxu2  ;;  %v908_v46 = vadd.f32 %v1597_v35, %v900_v34 }
 0x1f4   :  { %v889_v2 = vadd.f32 %v827_v37, %v1866_v17 }
 0x1f5   :  { %v912_v56 = vmax.f32 %v908_v46, 0.0 }
 0x1f6   :  { %v893_v44 = vrot.slane %v889_v2, 4 }
 0x1f7   :  { %v936_v0 = vsel %vm930_vm6, %v912_v56, 0.0 }
 0x1f8   :  { %v897_v50 = vsel %vm895_vm0, %v892_v26, %v893_v44 }
 0x1f9   :  { %v901_v17 = vadd.f32 %v897_v50, %v884_v22 }
 0x1fb   :  { %v909_v27 = vadd.f32 %v1597_v35, %v901_v17  ;;  %v829_v33 = vpop.f32.mrf.mxu2 }
 0x1fc   :  { %v890_v30 = vadd.f32 %v829_v33, %v1875_v28 }
 0x1fd   :  { %v913_v57 = vmax.f32 %v909_v27, 0.0 }
 0x1fe   :  { %v894_v60 = vrot.slane %v890_v30, 4 }
 0x1ff   :  { %v937_v39 = vsel %vm931_vm7, %v913_v57, 0.0 }
 0x200   :  { %v940_v41 = vmax.f32 %v936_v0, %v937_v39  ;;  %v896_v48 = vsel %vm895_vm0, %v893_v44, %v894_v60  ;;  %v899_v51 = vsel %vm895_vm0, %v894_v60, %v891_v24 }
 0x201   :  { %v902_v4 = vadd.f32 %v896_v48, %v885_v61  ;;  %v903_v52 = vadd.f32 %v899_v51, %v886_v18 }
 0x202   :  { %v941_v28 = vrot.slane %v940_v41, 4 }
 0x203   :  { %v910_v58 = vadd.f32 %v1597_v35, %v902_v4  ;;  %v911_v54 = vadd.f32 %v1597_v35, %v903_v52 }
 0x204   :  { %v942_v63 = vmax.f32 %v940_v41, %v941_v28 }
 0x205   :  { %v914_v6 = vmax.f32 %v910_v58, 0.0  ;;  %v915_v59 = vmax.f32 %v911_v54, 0.0 }
 0x206   :  { %v943_v5 = vrot.slane %v942_v63, 2 }
 0x207   :  { %v938_v7 = vsel %vm930_vm6, %v914_v6, 0.0  ;;  %v939_v55 = vsel %vm931_vm7, %v915_v59, 0.0 }
 0x208   :  { %v947_v9 = vmax.f32 %v938_v7, %v939_v55  ;;  %v944_v10 = vmax.f32 %v942_v63, %v943_v5 }
 0x20a   :  { %v948_v12 = vrot.slane %v947_v9, 4  ;;  %v945_v14 = vrot.slane %v944_v10, 1 }
 0x20c   :  { %v949_v13 = vmax.f32 %v947_v9, %v948_v12  ;;  %v946_v16 = vmax.f32 %v944_v10, %v945_v14 }
 0x20e   :  { %v950_v15 = vrot.slane %v949_v13, 2  ;;  %v954_v22 = vpack.c.bf16 %v946_v16, %v946_v16 }
 0x210   :  { %v951_v18 = vmax.f32 %v949_v13, %v950_v15  ;;  %v978_v8 = vunpack.c.l.b16 %v954_v22 }
 0x212   :  { %v952_v20 = vrot.slane %v951_v18, 1 }
 0x214   :  { %v953_v21 = vmax.f32 %v951_v18, %v952_v20 }
 0x216   :  { %v955_v23 = vpack.c.bf16 %v953_v21, %v953_v21 }
 0x218   :  { %v979_v24 = vunpack.c.l.b16 %v955_v23 }
 0x21a   :  { %v981_v1 = vsel %vm980_vm8, %v979_v24, %v978_v8 }
 0x21b   :  { %v982_v26 = vpack.c.b16 %v981_v1, %v981_v1 }
 0x21d   :  { %1040 = vmatmul.bf16.vlgmr.msra.gmra.mxu3 %v982_v26 }
 0x2a0   :  { %v1041_v29 = vpop.f32.mrf.mxu3 }
 0x2a1   :  { %v1042_v11 = vadd.f32 %v1598_v3, %v1041_v29 }
 0x2a3   :  { %v1046_v31 = vsel %vm1045_vm9, %v1042_v11, -inf }
 0x2a4   :  { %1047 = vmax.xlane.f32.xlu2 %v1046_v31 }
 0x2a8   :  { %v1043_v19 = vpop.f32.mrf.mxu3 }
 0x317   :  { %v1048_v32 = vpop.xlane.xlu2 %1047 }
 0x318   :  { %v1049_v34 = vsub.f32 %v1042_v11, %v1048_v32 }
 0x31a   :  { %v1050_v35 = vmul.f32 1.442695, %v1049_v34 }
 0x31c   :  { %1599 = vpow2.f32 %v1050_v35 }
 0x322   :  { %v1600_v36 = vpop.eup %1599 }
 0x323   :  { %v1052_v37 = vsel %vm1045_vm9, %v1600_v36, 0.0 }
 0x324   :  { %1053 = vadd.xlane.f32.xlu2 %v1052_v37 }
 0x397   :  { %v1054_v40 = vpop.xlane.xlu2 %1053 }
 0x398   :  { %1601 = vrcp.f32 %v1054_v40 }
 0x39e   :  { %v1602_v42 = vpop.eup %1601 }
 0x39f   :  { %v1056_v2 = vmul.f32 %v1602_v42, %v1600_v36 }
 0x3a1   :  { %1057 = vst [vmem:[#allocation8] sm:$0x3] %v1056_v2 }
 0x3a2   :  { %1068 = dma.vmem_to_hbm [thread:$0]  %s1064_s13, 32, %s1066_s4, [#allocation4]  }
 0x3a3   :  { %1703 = dma.done.wait [#allocation4], 32  }
 0x3a4   :  { %1704 = vsyncadd [#allocation4], 4294967264 }
 0x3a5   :  { %1073 = vsyncpa [#allocation3], 1 }
 0x3a6   :  { %1074 = vsyncpa [#allocation6], 1 }
 0x3a7   :  { %1075 = vsyncpa [#allocation4], 1 }

</bundles_post_ra>
